<compile_context>
chip_gen: v6e
topology: v6e:2x2x1
jax: 0.10.0
libtpu: 0.0.40
codegen_flags: <defaults>
</compile_context>

<pallas_src>
import functools
import math

import jax
import jax.numpy as jnp
from jax.experimental import pallas as pl
from jax.experimental.pallas import tpu as pltpu


# ----------------------------- Pallas kernel --------------------------------

def _cauchy_reward_kernel(x_ref, rffw_ref, rffb_ref, lw_ref, lb_ref, o_ref,
                          *, compute_dtype):
    """o[0, :] = sum(cos(X @ rffW + rffb) * (lin_w / sqrt(R)), -1) + lin_b."""
    x = x_ref[...]                        # [TM, F] f32
    if compute_dtype != jnp.float32:
        x = x.astype(compute_dtype)       # free VPU cast -> native bf16 MXU path
    rffw = rffw_ref[...]                  # [F, R]  (f32 or bf16, pre-cast in wrapper)
    rffb = rffb_ref[...]                  # [1, R]  f32

    r = rffw_ref.shape[-1]                # static
    inv_sqrt_rff = jnp.float32(1.0 / math.sqrt(r))
    # Fold the 1/sqrt(R) scale into the tiny [1, R] linear weight: a single
    # one-vreg multiply instead of a [TM, R] full-tensor VPU scale.
    lw = lw_ref[...] * inv_sqrt_rff       # [1, R] f32

    # MXU projection (f32 accumulate) + bias, then cos on the VPU/EUP.
    proj = jnp.dot(x, rffw, preferred_element_type=jnp.float32) + rffb    # [TM, R]
    rff = jnp.cos(proj)                                                   # [TM, R]

    # Width-1 matmul replaced by VPU multiply + cross-lane (XLU) reduce;
    # scalar bias comes from SMEM.  Store lane-dense as one [TM]-wide row.
    o_ref[0, :] = jnp.sum(rff * lw, axis=-1) + lb_ref[0]                  # [TM]


def _round_up(n, m):
    return ((n + m - 1) // m) * m


def _cdiv(a, b):
    return -(-a // b)


def cauchy_reward_forward(X, rffW, rffb, lin_w, lin_b, *,
                          tm_max=2048, use_bf16_matmul=False):
    """X: [N, F]; rffW: [F, R]; rffb: [R]; lin_w: [R, 1]; lin_b: [1]."""
    N, F = X.shape
    R = rffW.shape[1]

    # Padding-aware row-tile selection (bounds waste to < 8 rows per tile).
    n8 = _round_up(max(N, 1), 8)
    num_tiles = max(1, _cdiv(n8, tm_max))
    tm = _round_up(_cdiv(n8, num_tiles), 8)
    n_pad = tm * num_tiles
    if n_pad != N:
        X = jnp.pad(X, ((0, n_pad - N), (0, 0)))

    compute_dtype = jnp.bfloat16 if use_bf16_matmul else jnp.float32
    rffw_cast = rffW.astype(compute_dtype)                # pinned, only F*R*2-4 bytes
    rffb2 = rffb.reshape(1, R).astype(jnp.float32)
    lw_row = lin_w.reshape(1, R).astype(jnp.float32)      # lane-major [1, R]
    lb = lin_b.reshape(1).astype(jnp.float32)             # scalar -> SMEM

    cost = pl.CostEstimate(
        flops=2 * n_pad * F * R + 2 * n_pad * R,
        transcendentals=n_pad * R,
        bytes_accessed=4 * (n_pad * F + F * R + 2 * R + 1 + n_pad),
    )

    kernel = functools.partial(_cauchy_reward_kernel, compute_dtype=compute_dtype)

    out = pl.pallas_call(
        kernel,
        # Lane-dense output layout: one [1, TM] row per grid step.
        out_shape=jax.ShapeDtypeStruct((num_tiles, tm), jnp.float32),
        grid=(num_tiles,),
        in_specs=[
            pl.BlockSpec((tm, F), lambda i: (i, 0)),            # X: streamed row tiles
            pl.BlockSpec((F, R), lambda i: (0, 0)),             # rffW: pinned
            pl.BlockSpec((1, R), lambda i: (0, 0)),             # rffb: pinned
            pl.BlockSpec((1, R), lambda i: (0, 0)),             # lin_w: pinned, lane-major
            pl.BlockSpec(memory_space=pltpu.MemorySpace.SMEM),  # lin_b: scalar in SMEM
        ],
        out_specs=pl.BlockSpec((1, tm), lambda i: (i, 0)),
        compiler_params=pltpu.CompilerParams(
            dimension_semantics=("parallel",),   # shards row tiles across v7x's 2 TCs
            vmem_limit_bytes=32 << 20,           # ~5 MiB worst case at tm=4096; ample headroom
        ),
        cost_estimate=cost,
    )(X, rffw_cast, rffb2, lw_row, lb)

    # (num_tiles, tm) row-major == row order; drop padded rows, back to [N, 1].
    return out.reshape(n_pad, 1)[:N]


# ------------------------------- JAX glue ------------------------------------

def featurize(context, actions):
    """InteractionsEncoder(['a','xa']) for dense numeric features.

    context: [B, Dx], actions: [B, A, Da]
    returns X: [B*A, Da + Dx*Da]  (features 'a' then flattened 'x (x) a')
    """
    B, Dx = context.shape
    _, A, Da = actions.shape
    a_feat = actions.reshape(B * A, Da)                        # 'a'
    xa = context[:, None, :, None] * actions[:, :, None, :]    # [B, A, Dx, Da]
    xa_feat = xa.reshape(B * A, Dx * Da)                       # 'xa'
    return jnp.concatenate([a_feat, xa_feat], axis=1).astype(jnp.float32)


def init_params(key, n_features, numrff, sigma):
    """Deterministic analogue of CauchyRewardModel.define()."""
    k1, k2, k3, k4 = jax.random.split(key, 4)
    # torch.empty(F, R).cauchy_(sigma=sigma) -> inverse-CDF sample.
    u = jax.random.uniform(k1, (n_features, numrff), dtype=jnp.float32,
                           minval=1e-6, maxval=1.0 - 1e-6)
    rffW = sigma * jnp.tan(jnp.pi * (u - 0.5))
    # 2*pi*torch.rand(R)
    rffb = 2.0 * jnp.pi * jax.random.uniform(k2, (numrff,), dtype=jnp.float32)
    # nn.Linear(numrff, 1) default init: U(-1/sqrt(R), 1/sqrt(R))
    bound = 1.0 / math.sqrt(numrff)
    lin_w = jax.random.uniform(k3, (numrff, 1), dtype=jnp.float32,
                               minval=-bound, maxval=bound)
    lin_b = jax.random.uniform(k4, (1,), dtype=jnp.float32,
                               minval=-bound, maxval=bound)
    return rffW, rffb, lin_w, lin_b


def reference_forward(X, rffW, rffb, lin_w, lin_b):
    rff = jnp.cos(X @ rffW + rffb) / jnp.sqrt(jnp.float32(rffW.shape[1]))
    return rff @ lin_w + lin_b


# --------------------------------- main --------------------------------------

if __name__ == "__main__":
    key = jax.random.PRNGKey(0)
    kc, ka, kp = jax.random.split(key, 3)

    B, Dx = 2, 8          # batch of contexts, context dim
    A, Da = 4, 4          # actions per context, action dim
    numrff, sigma = 128, 1.0

    context = jax.random.normal(kc, (B, Dx), dtype=jnp.float32)
    actions = jax.random.normal(ka, (B, A, Da), dtype=jnp.float32)

    # TODO(synk): featurize() covers InteractionsEncoder(['a','xa']) only for
    # dense numeric context/action features (the hot path); dict/sparse
    # encoding stays host-side as in the PyTorch module.
    X = featurize(context, actions)                 # [B*A, Da + Dx*Da] = [8, 36]
    n_features = X.shape[1]
    rffW, rffb, lin_w, lin_b = init_params(kp, n_features, numrff, sigma)

    # f32 path by default (use_bf16_matmul=True is the v6e/v7x MXU fast path,
    # gated off because it can exceed the 1e-5 reference tolerance).
    out = cauchy_reward_forward(X, rffW, rffb, lin_w, lin_b)
    out = jax.block_until_ready(out)

    ref = reference_forward(X, rffW, rffb, lin_w, lin_b)
    assert out.shape == (B * A, 1), out.shape
    assert jnp.allclose(out, ref, atol=1e-5, rtol=1e-5), (out, ref)

    print("KERNEL_OK")
</pallas_src>

<mosaic_0001>
module attributes {stable_mosaic.version = 11 : i64} {
  func.func @_cauchy_reward_kernel(%arg0: i32, %arg1: memref<8x36xf32, #tpu.memory_space<vmem>>, %arg2: memref<36x128xf32, #tpu.memory_space<vmem>>, %arg3: memref<1x128xf32, #tpu.memory_space<vmem>>, %arg4: memref<1x128xf32, #tpu.memory_space<vmem>>, %arg5: memref<1xf32, #tpu.memory_space<smem>>, %arg6: memref<1x8xf32, #tpu.memory_space<vmem>>) attributes {dimension_semantics = [#tpu.dimension_semantics<parallel>], iteration_bounds = array<i64: 1>, scalar_prefetch = 0 : i64, scratch_operands = 0 : i64, tpu.core_type = #tpu.core_type<tc>, window_params = [{transform_indices = @transform_0, window_bounds = array<i64: 8, 36>}, {pipeline_mode = #tpu.pipeline_mode<synchronous>, transform_indices = @transform_1, window_bounds = array<i64: 36, 128>}, {pipeline_mode = #tpu.pipeline_mode<synchronous>, transform_indices = @transform_2, window_bounds = array<i64: 1, 128>}, {pipeline_mode = #tpu.pipeline_mode<synchronous>, transform_indices = @transform_3, window_bounds = array<i64: 1, 128>}, {transform_indices = @transform_4, window_bounds = array<i64: 1>}, {transform_indices = @transform_5, window_bounds = array<i64: 1, 8>}]} {
    %c0 = arith.constant 0 : index
    %c0_0 = arith.constant 0 : index
    %0 = vector.load %arg1[%c0, %c0_0] : memref<8x36xf32, #tpu.memory_space<vmem>>, vector<8x36xf32>
    %c0_1 = arith.constant 0 : index
    %c0_2 = arith.constant 0 : index
    %1 = vector.load %arg2[%c0_1, %c0_2] : memref<36x128xf32, #tpu.memory_space<vmem>>, vector<36x128xf32>
    %c0_3 = arith.constant 0 : index
    %c0_4 = arith.constant 0 : index
    %2 = vector.load %arg3[%c0_3, %c0_4] : memref<1x128xf32, #tpu.memory_space<vmem>>, vector<1x128xf32>
    %c0_5 = arith.constant 0 : index
    %c0_6 = arith.constant 0 : index
    %3 = vector.load %arg4[%c0_5, %c0_6] : memref<1x128xf32, #tpu.memory_space<vmem>>, vector<1x128xf32>
    %cst = arith.constant 0.0883883461 : f32
    %4 = vector.broadcast %cst : f32 to vector<1x128xf32>
    %5 = arith.mulf %3, %4 : vector<1x128xf32>
    %cst_7 = arith.constant dense<0.000000e+00> : vector<8x128xf32>
    %6 = tpu.matmul %0, %1, %cst_7 {dimension_numbers = #tpu.dot_dimension_numbers<[1], [0], [0], [1], [0, 0, 1, 1], [], []>} : vector<8x36xf32>, vector<36x128xf32>, vector<8x128xf32> -> vector<8x128xf32>
    %7 = vector.broadcast %2 : vector<1x128xf32> to vector<8x128xf32>
    %8 = arith.addf %6, %7 : vector<8x128xf32>
    %9 = math.cos %8 : vector<8x128xf32>
    %10 = vector.broadcast %5 : vector<1x128xf32> to vector<8x128xf32>
    %11 = arith.mulf %9, %10 : vector<8x128xf32>
    %cst_8 = arith.constant dense<0.000000e+00> : vector<8xf32>
    %12 = vector.multi_reduction <add>, %11, %cst_8 [1] : vector<8x128xf32> to vector<8xf32>
    %c0_9 = arith.constant 0 : index
    %13 = memref.load %arg5[%c0_9] : memref<1xf32, #tpu.memory_space<smem>>
    %14 = vector.broadcast %13 : f32 to vector<8xf32>
    %15 = arith.addf %12, %14 : vector<8xf32>
    %c0_10 = arith.constant 0 : index
    %c0_11 = arith.constant 0 : index
    %16 = vector.load %arg6[%c0_10, %c0_11] : memref<1x8xf32, #tpu.memory_space<vmem>>, vector<1x8xf32>
    %17 = vector.shape_cast %16 : vector<1x8xf32> to vector<8xf32>
    %18 = vector.shape_cast %15 : vector<8xf32> to vector<1x8xf32>
    tpu.vector_store %arg6[%c0_10, %c0_11], %18 {strides = array<i32>} : memref<1x8xf32, #tpu.memory_space<vmem>>, vector<1x8xf32>,
    return
  }
  func.func @transform_0(%arg0: i32) -> (i32, i32) {
    %c0_i32 = arith.constant 0 : i32
    %c0_i32_0 = arith.constant 0 : i32
    return %arg0, %c0_i32 : i32, i32
  }
  func.func @transform_1(%arg0: i32) -> (i32, i32) {
    %c0_i32 = arith.constant 0 : i32
    %c0_i32_0 = arith.constant 0 : i32
    %c0_i32_1 = arith.constant 0 : i32
    return %c0_i32, %c0_i32_0 : i32, i32
  }
  func.func @transform_2(%arg0: i32) -> (i32, i32) {
    %c0_i32 = arith.constant 0 : i32
    %c0_i32_0 = arith.constant 0 : i32
    %c0_i32_1 = arith.constant 0 : i32
    return %c0_i32, %c0_i32_0 : i32, i32
  }
  func.func @transform_3(%arg0: i32) -> (i32, i32) {
    %c0_i32 = arith.constant 0 : i32
    %c0_i32_0 = arith.constant 0 : i32
    %c0_i32_1 = arith.constant 0 : i32
    return %c0_i32, %c0_i32_0 : i32, i32
  }
  func.func @transform_4(%arg0: i32) -> i32 {
    %c0_i32 = arith.constant 0 : i32
    %c0_i32_0 = arith.constant 0 : i32
    return %c0_i32 : i32
  }
  func.func @transform_5(%arg0: i32) -> (i32, i32) {
    %c0_i32 = arith.constant 0 : i32
    %c0_i32_0 = arith.constant 0 : i32
    return %arg0, %c0_i32 : i32, i32
  }
}

</mosaic_0001>

<bundles_post_ra>
// kernel: tpu_custom_call.1
= control target key start
LH: loop header
LB: loop body
LE: loop exit
PB: predicated region body
PF: predicated region fallthrough
CT: control target
= control target key end

     0   :  { %11 = vsyncpa [#allocation4], 0  ;;  %s477_s0 = inlined_call_operand.hbm [shape: f32[8,36], index: 0, kind: input, shape index: {}]   ;;  %s478_s1 = inlined_call_operand.hbm [shape: f32[36,128], index: 1, kind: input, shape index: {}]   ;;  %s479_s2 = inlined_call_operand.vmem [shape: f32[1,128], index: 2, kind: input, shape index: {}]   ;;  %s480_s3 = inlined_call_operand.vmem [shape: f32[1,128], index: 3, kind: input, shape index: {}]   ;;  %s481_s4 = inlined_call_operand.<no memory space> [shape: f32[1], index: 4, kind: input, shape index: {}]   ;;  %s482_s5 = inlined_call_operand.hbm [shape: f32[1,8], index: 5, kind: output, shape index: {}]  }
   0x1   :  { %12 = vsyncpa [#allocation7], 0 }
   0x2   :  { %13 = vsyncpa [#allocation5], 0  ;;  %s395_s18 = smov [#allocation3]   ;;  %s396_s20 = smov [#allocation6]  }
   0x3   :  { %s20_s19 = sshll.u32 %s395_s18, 4  ;;  %s29_s21 = sshll.u32 %s396_s20, 4  ;;  %s21_s19 = int_to_ptr.vmem [resolvable:$true] %s20_s19  ;;  %s30_s21 = int_to_ptr.vmem [resolvable:$true] %s29_s21 }
   0x4   :  { %s337_s22 = scalar_lea.vmem %s21_s19, 128  ;;  %p342_p1 = scmp.lt.s32.totalorder %s21_s19, %s21_s19 }
   0x5   :  { %p338_p0 = scmp.ne.s32.totalorder %s21_s19, %s337_s22  ;;  %p343_p2 = scmp.lt.s32.totalorder %s337_s22, %s337_s22 }
   0x7   :  { %p344_p3 = por %p343_p2, %p342_p1 }
   0x9   :  { %p345_p4 = pnand %p344_p3, %p338_p0 }
   0xb   :  { %348 = shalt.err (!%p345_p4)
}
   0xc   :  { %23 = dma.hbm_to_vmem [thread:$0]  %s477_s0, 128, %s21_s19, [#allocation4]  }
   0xd   :  { %s357_s25 = scalar_lea.vmem %s30_s21, 640  ;;  %p362_p6 = scmp.lt.s32.totalorder %s30_s21, %s30_s21 }
   0xe   :  { %p358_p5 = scmp.ne.s32.totalorder %s30_s21, %s357_s25  ;;  %p363_p7 = scmp.lt.s32.totalorder %s357_s25, %s357_s25 }
  0x10   :  { %p364_p8 = por %p363_p7, %p362_p6 }
  0x12   :  { %p365_p9 = pnand %p364_p8, %p358_p5 }
  0x14   :  { %368 = shalt.err (!%p365_p9)
}
  0x15   :  { %s397_s26 = smov 128   ;;  %s398_s27 = smov 8  }
  0x16   :  { %35 = dma.hbm_to_vmem [thread:$0]  %s478_s1, 640, %s30_s21, [#allocation7], %s397_s26, %s397_s26, %s398_s27  }
  0x17   :  { %389 = dma.done.wait [#allocation4], 128  }
  0x18   :  { %390 = vsyncadd [#allocation4], 4294967168 }
  0x19   :  { %391 = dma.done.wait [#allocation7], 640  }
  0x1a   :  { %392 = vsyncadd [#allocation7], 4294966656  ;;  %v399_v0 = vmov 0.0   ;;  %vm400_vm0 = vmmov 0   ;;  %vm67_vm1 = vcmask 1043456   ;;  %v52_v2 = vld [vmem:[#allocation6 + $0x18] sm:$0xff] }
  0x1b   :  { %295 = vmatprep.subr.mxu0 %v399_v0  ;;  %305 = vmatprep.mubr.msk.f32.mxu0 %vm400_vm0, %v399_v0  ;;  %v53_v1 = vld [vmem:[#allocation6 + $0x20] sm:$0xf]  ;;  %v51_v3 = vld [vmem:[#allocation6 + $0x10] sm:$0xff]  ;;  %v50_v4 = vld [vmem:[#allocation6 + $0x8] sm:$0xff]  ;;  %vm63_vm2 = vcmask 293888   ;;  %s407_s7 = smov [#allocation8]  }
  0x1c   :  { %296 = vmatpush3.msk.msra.mxu0 %vm67_vm1, %v53_v1  ;;  %v49_v5 = vld [vmem:[#allocation6] sm:$0xff]  ;;  %v48_v6 = vld [vmem:[#allocation3] sm:$0xff]  ;;  %v401_v22 = vmov 2102212464   ;;  %v402_v24 = vmov 920167782  }
  0x1d   :  { %297 = vmatprep.subr.mxu0 %v399_v0  ;;  %v282_v7 = vld [vmem:[%s479_s2] ss:$0 sm:$0xff]  ;;  %v403_v28 = vmov 1326507024   ;;  %v404_v30 = vmov 683565275  }
  0x1e   :  { %298 = vmatpush3.msra.mxu0 %v52_v2  ;;  %v405_v32 = vmov 2475754826   ;;  %v406_v35 = vmov 2131351028   ;;  %s272_s8 = sshll.u32 %s407_s7, 4  ;;  %vm264_vm0 = vcmask 57344   ;;  %s273_s8 = int_to_ptr.vmem [resolvable:$true] %s272_s8 }
  0x1f   :  { %299 = vmatprep.subr.mxu0 %v399_v0  ;;  %s369_s9 = scalar_lea.vmem %s273_s8, 16  ;;  %s373_s10 = scalar_lea.vmem %s273_s8, 32 }
  0x20   :  { %300 = vmatpush3.msra.mxu0 %v51_v3  ;;  %p370_p10 = scmp.ne.s32.totalorder %s273_s8, %s369_s9  ;;  %p374_p11 = scmp.lt.s32.totalorder %s273_s8, %s273_s8 }
  0x21   :  { %301 = vmatprep.subr.mxu0 %v399_v0  ;;  %p375_p12 = scmp.lt.s32.totalorder %s373_s10, %s369_s9 }
  0x22   :  { %302 = vmatpush3.msra.mxu0 %v50_v4 }
  0x23   :  { %303 = vmatprep.subr.mxu0 %v399_v0  ;;  %p376_p13 = por %p375_p12, %p374_p11 }
  0x24   :  { %304 = vmatpush3.msra.mxu0 %v49_v5 }
  0x25   :  { %306 = vmatmul.mubr.msk.f32.vlgmr.msra.gmra.mxu0 %vm63_vm2, %v48_v6  ;;  %p377_p0 = pnand %p376_p13, %p370_p10 }
  0xe5   :  { %v137_v8 = vpop.f32.mrf.mxu0 }
  0xe6   :  { %v447_v9 = vadd.f32 %v282_v7, %v137_v8 }
  0xe7   :  { %v307_v10 = vpop.f32.mrf.mxu0 }
  0xe8   :  { %v144_v11 = vand.u32 2139095040, %v447_v9  ;;  %v141_v12 = vand.u32 2147483647, %v447_v9  ;;  %vm143_vm10 = vcmp.lt.s32.totalorder %v447_v9, 0  ;;  %vm233_vm15 = vweird.f32 %v447_v9 }
  0xea   :  { %v145_v13 = vshrl.u32 %v144_v11, 23  ;;  %v148_v15 = vand.u32 8388607, %v141_v12  ;;  %vm142_vm11 = vcmp.le.f32.partialorder %v141_v12, 0.7853982 }
  0xec   :  { %v285_v14 = vadd.s32 4294967169, %v145_v13  ;;  %v149_v18 = vor.u32 8388608, %v148_v15 }
  0xee   :  { %v151_v16 = vadd.s32 1, %v285_v14  ;;  %v189_v26 = vshll.u32 %v149_v18, 8 }
  0xf0   :  { %vm152_vm3 = vcmp.gt.s32.totalorder %v151_v16, 0 }
  0xf1   :  { %v153_v17 = vsel %vm152_vm3, %v151_v16, 0 }
  0xf2   :  { %v155_v19 = vand.u32 31, %v153_v17  ;;  %v154_v20 = vshrl.u32 %v153_v17, 5 }
  0xf4   :  { %v156_v21 = vsub.s32 32, %v155_v19  ;;  %v167_v23 = vshll.u32 %v401_v22, %v155_v19  ;;  %v170_v25 = vshll.u32 %v402_v24, %v155_v19  ;;  %v158_v31 = vshll.u32 %v404_v30, %v155_v19 }
  0xf5   :  { %v161_v34 = vshll.u32 %v405_v32, %v155_v19  ;;  %v164_v37 = vshll.u32 %v406_v35, %v155_v19  ;;  %vm176_vm4 = vcmp.lt.s32.totalorder %v154_v20, 4  ;;  %vm173_vm5 = vcmp.lt.s32.totalorder %v154_v20, 1 }
  0xf6   :  { %v168_v27 = vshrl.u32 %v402_v24, %v156_v21  ;;  %v171_v29 = vshrl.u32 %v403_v28, %v156_v21  ;;  %v159_v33 = vshrl.u32 %v405_v32, %v156_v21  ;;  %v162_v36 = vshrl.u32 %v406_v35, %v156_v21  ;;  %v55_v32 = vld [vmem:[%s480_s3] sm:$0x1] }
  0xf7   :  { %v165_v38 = vshrl.u32 %v401_v22, %v156_v21  ;;  %v157_v42 = vshrl.u32 %v404_v30, %v156_v21  ;;  %vm174_vm6 = vcmp.lt.s32.totalorder %v154_v20, 2  ;;  %vm175_vm7 = vcmp.lt.s32.totalorder %v154_v20, 3 }
  0xf8   :  { %v169_v39 = vor.u32 %v168_v27, %v167_v23  ;;  %v172_v40 = vor.u32 %v171_v29, %v170_v25  ;;  %v160_v41 = vor.u32 %v159_v33, %v158_v31  ;;  %v163_v43 = vor.u32 %v162_v36, %v161_v34 }
  0xf9   :  { %v166_v44 = vor.u32 %v165_v38, %v164_v37  ;;  %v245_v28 = vlaneseq  ;;  %v56_v34 = vmul.f32 0.088388346, %v55_v32 }
  0xfa   :  { %v182_v45 = vsel %vm176_vm4, %v169_v39, 920167782  ;;  %v186_v46 = vsel %vm176_vm4, %v172_v40, 1326507024  ;;  %v181_v48 = vsel %vm173_vm5, %v160_v41, %v163_v43  ;;  %v177_v51 = vsel %vm173_vm5, %v157_v42, %v160_v41 }
  0xfb   :  { %v178_v47 = vsel %vm176_vm4, %v166_v44, 2102212464  ;;  %v183_v49 = vsel %vm175_vm7, %v166_v44, %v182_v45  ;;  %v185_v50 = vsel %vm173_vm5, %v163_v43, %v166_v44  ;;  %v187_v54 = vsel %vm175_vm7, %v169_v39, %v186_v46 }
  0xfc   :  { %v179_v52 = vsel %vm175_vm7, %v163_v43, %v178_v47  ;;  %v184_v53 = vsel %vm174_vm6, %v181_v48, %v183_v49  ;;  %v188_v55 = vsel %vm174_vm6, %v185_v50, %v187_v54  ;;  %v246_v31 = vshrl.u32 %v245_v28, 7 }
  0xfd   :  { %v453_v56 = vmul.u32.u64.low %v189_v26, %v184_v53  ;;  %v454_v57 = vmul.u32.u64.high %v189_v26, %v184_v53, %v453_v56  ;;  %v456_v58 = vmul.u32.u64.low %v189_v26, %v188_v55  ;;  %v457_v59 = vmul.u32.u64.high %v189_v26, %v188_v55, %v456_v58 }
  0xfe   :  { %v180_v60 = vsel %vm174_vm6, %v177_v51, %v179_v52  ;;  %v247_v35 = vsub.s32 0, %v246_v31  ;;  %v258_v45 = vand.u32 127, %v245_v28  ;;  %v254_v46 = vstv %s481_s4 }
  0xff   :  { %v199_v61 = vadd.s32 1, %v454_v57  ;;  %v196_v62 = vmul.u32 %v189_v26, %v180_v60  ;;  %vm198_vm8 = vc.u32 %v457_v59, %v453_v56  ;;  %v197_v11 = vadd.s32 %v453_v56, %v457_v59 }
 0x100   :  { %v248_v40 = vrot.slane %v56_v34, %v247_v35  ;;  %v261_v47 = vsub.s32 %v258_v45, %v246_v31 }
 0x101   :  { %v200_v63 = vsel %vm198_vm8, %v199_v61, %v454_v57 }
 0x102   :  { %v201_v0 = vadd.s32 %v200_v63, %v196_v62 }
 0x104   :  { %v202_v1 = vadd.s32 536870912, %v201_v0 }
 0x106   :  { %v203_v2 = vshrl.u32 %v202_v1, 30 }
 0x108   :  { %v204_v3 = vshll.u32 %v203_v2, 30  ;;  %v227_v27 = vsub.s32 4, %v203_v2 }
 0x10a   :  { %v205_v4 = vsub.s32 %v201_v0, %v204_v3  ;;  %v228_v29 = vsel %vm143_vm10, %v227_v27, %v203_v2 }
 0x10b   :  { %v230_v30 = vsel %vm142_vm11, 0, %v228_v29 }
 0x10c   :  { %v207_v5 = vsub.s32 0, %v205_v4  ;;  %v234_v33 = vand.u32 3, %v230_v30 }
 0x10e   :  { %v286_v6 = vmin.u32 %v207_v5, %v205_v4  ;;  %vm239_vm12 = vcmp.eq.s32.totalorder %v234_v33, 2  ;;  %vm236_vm13 = vcmp.eq.s32.totalorder %v234_v33, 0  ;;  %vm235_vm14 = vcmp.lt.s32.totalorder %v234_v33, 2 }
 0x110   :  { %v209_v7 = vclz %v286_v6 }
 0x112   :  { %v287_v8 = vadd.s32 4294967294, %v209_v7 }
 0x114   :  { %vm288_vm9 = vcmp.lt.s32.totalorder %v287_v8, 0 }
 0x115   :  { %v212_v10 = vsel %vm288_vm9, 0, %v287_v8 }
 0x116   :  { %v213_v13 = vsub.s32 32, %v212_v10  ;;  %v217_v14 = vsub.s32 4294967266, %v212_v10  ;;  %v214_v15 = vshll.u32 %v205_v4, %v212_v10 }
 0x118   :  { %v215_v16 = vshrl.u32 %v197_v11, %v213_v13  ;;  %v218_v17 = vadd.s32 127, %v217_v14 }
 0x11a   :  { %v216_v18 = vor.u32 %v215_v16, %v214_v15  ;;  %v219_v19 = vshll.u32 %v218_v17, 23 }
 0x11c   :  { %v220_v20 = vor.u32 4788187, %v219_v19  ;;  %v223_v22 = vcvt.s32.f32 %v216_v18 }
 0x11e   :  { %v221_v21 = vand.u32 2147483647, %v220_v20 }
 0x120   :  { %v224_v23 = vmul.f32 %v223_v22, %v221_v21 }
 0x122   :  { %v225_v24 = vxor.u32 2147483648, %v224_v23 }
 0x124   :  { %v226_v25 = vsel %vm143_vm10, %v225_v24, %v224_v23 }
 0x125   :  { %v229_v26 = vsel %vm142_vm11, %v447_v9, %v226_v25 }
 0x126   :  { %325 = vcosq.f32 %v229_v26 }
 0x127   :  { %327 = vsinq.f32 %v229_v26 }
 0x133   :  { %v326_v36 = vpop.eup %325 }
 0x134   :  { %v328_v37 = vpop.eup %327  ;;  %v240_v12 = vxor.u32 2147483648, %v326_v36 }
 0x135   :  { %v237_v38 = vxor.u32 2147483648, %v328_v37 }
 0x136   :  { %v241_v39 = vsel %vm239_vm12, %v240_v12, %v328_v37 }
 0x137   :  { %v238_v41 = vsel %vm236_vm13, %v326_v36, %v237_v38 }
 0x138   :  { %v242_v42 = vsel %vm235_vm14, %v238_v41, %v241_v39 }
 0x139   :  { %v243_v43 = vsel %vm233_vm15, nan, %v242_v42 }
 0x13a   :  { %v250_v44 = vmul.f32 %v248_v40, %v243_v43 }
 0x13c   :  { %251 = vadd.xlane.f32.xlu0 %v250_v44 }
 0x1c5   :  { %v252_v48 = vpop.xlane.xlu0 %251 }
 0x1c6   :  { %v255_v49 = vadd.f32 %v254_v46, %v252_v48 }
 0x1c8   :  { %v262_v50 = vrot.slane %v255_v49, %v261_v47 }
 0x1ca   :  { %265 = vst.msk [vmem:[#allocation8] sm:$0x1] %vm264_vm0, %v262_v50 }
 0x1cb   :  { %380 = shalt.err (!%p377_p0)
}
 0x1cc   :  { %275 = dma.vmem_to_hbm [thread:$0]  %s273_s8, 16, %s482_s5, [#allocation5]  }
 0x1cd   :  { %393 = dma.done.wait [#allocation5], 16  }
 0x1ce   :  { %394 = vsyncadd [#allocation5], 4294967280 }
 0x1cf   :  { %279 = vsyncpa [#allocation4], 1 }
 0x1d0   :  { %280 = vsyncpa [#allocation7], 1 }
 0x1d1   :  { %281 = vsyncpa [#allocation5], 1 }

</bundles_post_ra>
